<compile_context>
chip_gen: v5e
topology: v5e:2x2
jax: 0.10.0
libtpu: 0.0.40
codegen_flags: <defaults>
</compile_context>

<pallas_src>
import functools
import math

import jax
import jax.numpy as jnp
from jax import lax
from jax.experimental import pallas as pl
from jax.experimental.pallas import tpu as pltpu

BBOX_XFORM_CLIP = float(jnp.log(1000.0 / 16.0))


def _round_up(n, m):
    return ((n + m - 1) // m) * m


# ---------------------------------------------------------------------------
# Pallas kernel: fused FastRCNN head
#   h1  = relu(X @ W1 + b1)
#   h2  = relu(h1 @ W2 + b2)
#   out = h2 @ [Wc | Wr] + [bc | br]     (single 128-wide matmul + store)
# ---------------------------------------------------------------------------
def _fastrcnn_head_kernel(x_ref, w1_ref, b1_ref, w2_ref, b2_ref,
                          wcr_ref, bcr_ref, out_ref):
    x = x_ref[...]                                               # bf16 [tr, F]
    h1 = jnp.dot(x, w1_ref[...],
                 preferred_element_type=jnp.float32) + b1_ref[...]
    h1 = jnp.maximum(h1, 0.0)
    h2 = jnp.dot(h1.astype(w2_ref.dtype), w2_ref[...],
                 preferred_element_type=jnp.float32) + b2_ref[...]
    h2 = jnp.maximum(h2, 0.0)
    out_ref[...] = jnp.dot(h2.astype(wcr_ref.dtype), wcr_ref[...],
                           preferred_element_type=jnp.float32) + bcr_ref[...]


def _choose_row_tile(R):
    """Row tile for the head kernel.

    Large tiles (512-1024) amortize the ~0.35us per-grid-step overhead; once
    there is enough work we keep >= 2 grid steps so the "parallel" row axis can
    shard across both v7x TensorCores.  x is bf16, so tiles are multiples of 16
    (full packed sublanes)."""
    if R <= 256:
        return _round_up(max(R, 1), 16)          # one tile, no step overhead
    return min(1024, _round_up(pl.cdiv(R, 2), 16))


def _head_vmem_limit(tile_r, feat, hid, out_w):
    """Scoped-VMEM limit sized from the actual kernel footprint."""
    x_buf = 2 * tile_r * feat * 2                 # bf16 x, double-buffered
    o_buf = 2 * tile_r * out_w * 4                # f32 out, double-buffered
    w_buf = (feat * hid + hid * hid + hid * out_w) * 2   # bf16, single buffer
    b_buf = (2 * hid + out_w) * 4
    tmp = 2 * tile_r * max(hid, out_w) * 4        # h1/h2 f32 temporaries
    need = x_buf + o_buf + w_buf + b_buf + tmp + (4 << 20)
    # never go below the per-chip defaults; cap well under v5e/v6e physical.
    # TODO(synk): at production sizes on v7x (64 MiB physical VMEM) the
    # resident-weight plan should switch to a K grid axis + VMEM accumulator.
    return int(min(max(need, 32 << 20), 100 << 20))


def fastrcnn_head_pallas(x, w1, b1, w2, b2, wcr, bcr, *, tile_r,
                         vmem_limit_bytes):
    """x: [R_pad, F_pad] bf16 (R_pad multiple of tile_r, F_pad multiple of 128).
    Returns combined [R_pad, OUT_W] f32 with packed (cls | reg) columns."""
    r_pad, feat = x.shape
    hid = w1.shape[1]
    out_w = wcr.shape[1]
    grid = (r_pad // tile_r,)

    # Grid-invariant operands: whole array resident in VMEM (single buffer,
    # DMA'd once -- no per-step weight re-streaming / double-buffer waste).
    wspec = pl.BlockSpec(memory_space=pltpu.MemorySpace.VMEM)

    flops = 2 * r_pad * (feat * hid + hid * hid + hid * out_w)
    bytes_accessed = (r_pad * feat * 2                       # x (bf16)
                      + (feat * hid + hid * hid + hid * out_w) * 2
                      + (2 * hid + out_w) * 4
                      + r_pad * out_w * 4)                   # out (f32)

    return pl.pallas_call(
        _fastrcnn_head_kernel,
        out_shape=jax.ShapeDtypeStruct((r_pad, out_w), jnp.float32),
        grid=grid,
        in_specs=[
            pl.BlockSpec((tile_r, feat), lambda i: (i, 0)),   # x: tiled over R
            wspec, wspec, wspec, wspec, wspec, wspec,
        ],
        out_specs=pl.BlockSpec((tile_r, out_w), lambda i: (i, 0)),
        compiler_params=pltpu.CompilerParams(
            dimension_semantics=("parallel",),
            vmem_limit_bytes=vmem_limit_bytes),
        cost_estimate=pl.CostEstimate(flops=int(flops), transcendentals=0,
                                      bytes_accessed=int(bytes_accessed)),
    )(x, w1, b1, w2, b2, wcr, bcr)


# ---------------------------------------------------------------------------
# Glue: batched conv backbone, gather-based RoIAlign, box decoding (plain JAX)
# ---------------------------------------------------------------------------
def backbone_forward(images, w, b):
    """images: [B, 3, H, W] -> [B, C_feat, H/2, W/2] (3x3 conv s=2, ReLU)."""
    out = lax.conv_general_dilated(
        images, w, window_strides=(2, 2), padding="SAME",
        dimension_numbers=("NCHW", "OIHW", "NCHW"))
    return jnp.maximum(out + b[None, :, None, None], 0.0)


def roi_align_gather(fmap, rois, spatial_scale, output_size=7, sampling_ratio=2):
    """torchvision-style RoIAlign (aligned=False) via 4-corner gather bilinear
    sampling.  fmap: [C, H, W]; rois: [N, 4].  Returns [N, C*P*P] in torch
    flatten order ([N, C, P, P] -> flatten(start_dim=1))."""
    C, H, W = fmap.shape
    N = rois.shape[0]
    P, S = output_size, sampling_ratio
    scale = jnp.float32(spatial_scale)

    x1 = rois[:, 0] * scale
    y1 = rois[:, 1] * scale
    x2 = rois[:, 2] * scale
    y2 = rois[:, 3] * scale
    roi_w = jnp.maximum(x2 - x1, 1.0)
    roi_h = jnp.maximum(y2 - y1, 1.0)
    bin_w = (roi_w / P)[:, None, None]                       # [N,1,1]
    bin_h = (roi_h / P)[:, None, None]

    pidx = jnp.arange(P, dtype=jnp.float32)[None, :, None]
    sidx = jnp.arange(S, dtype=jnp.float32)[None, None, :]
    ys = y1[:, None, None] + pidx * bin_h + (sidx + 0.5) * bin_h / S   # [N,P,S]
    xs = x1[:, None, None] + pidx * bin_w + (sidx + 0.5) * bin_w / S   # [N,P,S]

    y = jnp.broadcast_to(ys[:, :, None, :, None], (N, P, P, S, S))
    x = jnp.broadcast_to(xs[:, None, :, None, :], (N, P, P, S, S))

    # torchvision: a sample contributes zero iff y < -1 or y > H (same for x)
    valid = (y >= -1.0) & (y <= H) & (x >= -1.0) & (x <= W)
    y = jnp.clip(y, 0.0, H - 1)
    x = jnp.clip(x, 0.0, W - 1)
    y0 = jnp.floor(y).astype(jnp.int32)
    x0 = jnp.floor(x).astype(jnp.int32)
    y1i = jnp.minimum(y0 + 1, H - 1)
    x1i = jnp.minimum(x0 + 1, W - 1)
    ly = y - y0.astype(jnp.float32)
    lx = x - x0.astype(jnp.float32)
    hy = 1.0 - ly
    hx = 1.0 - lx

    flat = fmap.reshape(C, H * W)
    gather = lambda iy, ix: jnp.take(flat, iy * W + ix, axis=1)  # [C,N,P,P,S,S]
    val = (gather(y0, x0) * (hy * hx)
           + gather(y0, x1i) * (hy * lx)
           + gather(y1i, x0) * (ly * hx)
           + gather(y1i, x1i) * (ly * lx))
    val = jnp.where(valid[None], val, 0.0)
    pooled = val.mean(axis=(-1, -2))                         # [C, N, P, P]
    pooled = jnp.transpose(pooled, (1, 0, 2, 3))             # [N, C, P, P]
    return pooled.reshape(N, C * P * P)


def offsets2boxes(offsets, rois):
    """offsets: [N, 4] (dx, dy, dw, dh); rois: [N, 4] (x1, y1, x2, y2).
    # TODO(synk): raw (unweighted) deltas; if the reference repo's BoxCoder uses
    # weights (e.g. torchvision's (10,10,5,5)), divide the deltas first."""
    w = rois[:, 2] - rois[:, 0]
    h = rois[:, 3] - rois[:, 1]
    cx = rois[:, 0] + 0.5 * w
    cy = rois[:, 1] + 0.5 * h
    dw = jnp.minimum(offsets[:, 2], BBOX_XFORM_CLIP)
    dh = jnp.minimum(offsets[:, 3], BBOX_XFORM_CLIP)
    pcx = cx + offsets[:, 0] * w
    pcy = cy + offsets[:, 1] * h
    pw = w * jnp.exp(dw)
    ph = h * jnp.exp(dh)
    return jnp.stack([pcx - 0.5 * pw, pcy - 0.5 * ph,
                      pcx + 0.5 * pw, pcy + 0.5 * ph], axis=-1)


def post_process_image(cls_logits, reg_deltas, rois, conf_threshold=0.05):
    """FastRCNNMultiHead.post_process up to (and including) box decoding +
    confidence masking.  Returns [N, 6] dets plus a validity mask.
    # TODO(synk): batched_nms and top-k keep are dynamic-shape, data-dependent
    # control flow with no static-shape Pallas/TPU equivalent; kept as a mask."""
    probs = jax.nn.softmax(cls_logits, axis=1)
    scores = probs.max(axis=1)
    preds = probs.argmax(axis=1)
    offsets = jnp.take_along_axis(
        reg_deltas, preds[:, None, None], axis=1)[:, 0, :]   # per-roi class deltas
    boxes = offsets2boxes(offsets, rois)
    valid = (preds != 0) & (scores >= conf_threshold)        # class 0 = background
    dets = jnp.concatenate(
        [boxes, scores[:, None], preds[:, None].astype(boxes.dtype)], axis=-1)
    return dets, valid


# ---------------------------------------------------------------------------
# Full FastRCNN forward (inference; targets=None)
# ---------------------------------------------------------------------------
def fastrcnn_forward(images, rois, params, num_classes, roi_output_size=7):
    """images: [B, 3, H, W]; rois: [B, N, 4] in image coordinates."""
    fmaps = backbone_forward(images, params["bb_w"], params["bb_b"])  # [B,C,Hf,Wf]
    B, C, Hf, Wf = fmaps.shape
    # MultiScaleRoIAlign scale inference: 2 ** round(log2(Hf / H))
    spatial_scale = 2.0 ** round(math.log2(Hf / images.shape[-2]))
    N = rois.shape[1]

    pooled = jax.vmap(
        lambda f, r: roi_align_gather(f, r, spatial_scale, roi_output_size, 2)
    )(fmaps, rois)                                            # [B, N, C*P*P]

    R = B * N
    x = pooled.reshape(R, -1).astype(jnp.bfloat16)            # MXU-native dtype
    f_in = x.shape[1]
    f_pad = params["w1"].shape[0]                             # multiple of 128
    tile_r = _choose_row_tile(R)
    r_pad = _round_up(R, tile_r)
    # pad + cast fuse into the pooling consumer under jit (no extra HBM copy)
    x = jnp.pad(x, ((0, r_pad - R), (0, f_pad - f_in)))

    hid = params["w1"].shape[1]
    out_w = params["wcr"].shape[1]
    out = fastrcnn_head_pallas(
        x, params["w1"], params["b1"], params["w2"], params["b2"],
        params["wcr"], params["bcr"], tile_r=tile_r,
        vmem_limit_bytes=_head_vmem_limit(tile_r, f_pad, hid, out_w))

    # packed output: cols [0:NC] = cls logits, [NC:5*NC] = reg deltas
    cls_logits = out[:R, :num_classes]
    reg_deltas = out[:R, num_classes:num_classes * 5].reshape(R, num_classes, 4)

    dets, valid = jax.vmap(post_process_image)(
        cls_logits.reshape(B, N, num_classes),
        reg_deltas.reshape(B, N, num_classes, 4),
        rois)

    # TODO(synk): training branch (build_targets / sample_fg_bg / losses) is
    # data-dependent sampling; only the targets=None inference path is built.
    return (cls_logits, reg_deltas), (dets, valid)


# ---------------------------------------------------------------------------
if __name__ == "__main__":
    key = jax.random.PRNGKey(0)
    k = jax.random.split(key, 12)

    B = 2                  # images
    IMG = 32               # image H = W
    FEAT = 4               # backbone output_channels
    P = 7                  # roi_output_size
    HID = 32               # logical hidden_channels (small demo)
    HID_PAD = 128          # padded hidden dim (dense MXU / lane-dense biases)
    NUM_CLASSES = 3        # includes background -> MultiHead
    N_ROIS = 8             # rois per image

    F_in = FEAT * P * P                       # 196
    F_PAD = _round_up(F_in, 128)              # 256: clean K / unmasked vld
    OUT_W = _round_up(NUM_CLASSES * 5, 128)   # 128: packed cls|reg output slab

    images = jax.random.normal(k[0], (B, 3, IMG, IMG), jnp.float32)

    # rois: (x1, y1, x2, y2) in image coordinates
    def make_rois(kk):
        k1, k2 = jax.random.split(kk)
        xy1 = jax.random.uniform(k1, (N_ROIS, 2), minval=0.0, maxval=20.0)
        wh = jax.random.uniform(k2, (N_ROIS, 2), minval=4.0, maxval=12.0)
        xy2 = jnp.minimum(xy1 + wh, IMG - 1.0)
        return jnp.concatenate([xy1, xy2], axis=-1)
    rois = jnp.stack([make_rois(k[2]), make_rois(k[3])])      # [B, N, 4]

    def init(kk, shape, scale=0.01):
        return scale * jax.random.normal(kk, shape, jnp.float32)

    # Linear weights stored as [in, out] (transposed vs torch [out, in]);
    # feature dim padded 196 -> 256, hidden dim 32 -> 128, cls/reg fused and
    # packed into a single 128-wide slab.
    w1 = jnp.pad(init(k[5], (F_in, HID)),
                 ((0, F_PAD - F_in), (0, HID_PAD - HID)))
    b1 = jnp.pad(init(k[6], (1, HID)), ((0, 0), (0, HID_PAD - HID)))
    w2 = jnp.pad(init(k[7], (HID, HID)),
                 ((0, HID_PAD - HID), (0, HID_PAD - HID)))
    b2 = jnp.pad(init(k[8], (1, HID)), ((0, 0), (0, HID_PAD - HID)))
    wc = init(k[9], (HID, NUM_CLASSES))
    bc = init(k[10], (1, NUM_CLASSES))
    wr = init(k[11], (HID, NUM_CLASSES * 4))
    br = jnp.zeros((1, NUM_CLASSES * 4), jnp.float32)
    wcr = jnp.pad(jnp.concatenate([wc, wr], axis=1),
                  ((0, HID_PAD - HID), (0, OUT_W - NUM_CLASSES * 5)))
    bcr = jnp.pad(jnp.concatenate([bc, br], axis=1),
                  ((0, 0), (0, OUT_W - NUM_CLASSES * 5)))

    params = {
        "bb_w": init(k[4], (FEAT, 3, 3, 3), 0.1),
        "bb_b": jnp.zeros((FEAT,), jnp.float32),
        "w1": w1.astype(jnp.bfloat16),
        "b1": b1,                                   # biases stay f32 (epilogue)
        "w2": w2.astype(jnp.bfloat16),
        "b2": b2,
        "wcr": wcr.astype(jnp.bfloat16),            # [128, 128]
        "bcr": bcr,                                 # [1, 128]
    }

    fwd = jax.jit(functools.partial(
        fastrcnn_forward, num_classes=NUM_CLASSES, roi_output_size=P))

    (cls_logits, reg_deltas), (dets, valid) = fwd(images, rois, params)

    jax.block_until_ready(cls_logits)
    jax.block_until_ready(reg_deltas)
    jax.block_until_ready(dets)
    jax.block_until_ready(valid)

    assert cls_logits.shape == (B * N_ROIS, NUM_CLASSES)
    assert reg_deltas.shape == (B * N_ROIS, NUM_CLASSES, 4)
    assert dets.shape == (B, N_ROIS, 6)
    assert valid.shape == (B, N_ROIS)
    print("KERNEL_OK")
</pallas_src>

<mosaic_0001>
module attributes {stable_mosaic.version = 11 : i64} {
  func.func @_fastrcnn_head_kernel(%arg0: i32, %arg1: memref<16x256xbf16, #tpu.memory_space<vmem>>, %arg2: memref<256x128xbf16, #tpu.memory_space<vmem>>, %arg3: memref<1x128xf32, #tpu.memory_space<vmem>>, %arg4: memref<128x128xbf16, #tpu.memory_space<vmem>>, %arg5: memref<1x128xf32, #tpu.memory_space<vmem>>, %arg6: memref<128x128xbf16, #tpu.memory_space<vmem>>, %arg7: memref<1x128xf32, #tpu.memory_space<vmem>>, %arg8: memref<16x128xf32, #tpu.memory_space<vmem>>) attributes {dimension_semantics = [#tpu.dimension_semantics<parallel>], iteration_bounds = array<i64: 1>, scalar_prefetch = 0 : i64, scratch_operands = 0 : i64, tpu.core_type = #tpu.core_type<tc>, window_params = [{transform_indices = @transform_0, window_bounds = array<i64: 16, 256>}, {pipeline_mode = #tpu.pipeline_mode<synchronous>, transform_indices = @transform_1, window_bounds = array<i64: 256, 128>}, {pipeline_mode = #tpu.pipeline_mode<synchronous>, transform_indices = @transform_2, window_bounds = array<i64: 1, 128>}, {pipeline_mode = #tpu.pipeline_mode<synchronous>, transform_indices = @transform_3, window_bounds = array<i64: 128, 128>}, {pipeline_mode = #tpu.pipeline_mode<synchronous>, transform_indices = @transform_4, window_bounds = array<i64: 1, 128>}, {pipeline_mode = #tpu.pipeline_mode<synchronous>, transform_indices = @transform_5, window_bounds = array<i64: 128, 128>}, {pipeline_mode = #tpu.pipeline_mode<synchronous>, transform_indices = @transform_6, window_bounds = array<i64: 1, 128>}, {transform_indices = @transform_7, window_bounds = array<i64: 16, 128>}]} {
    %c0 = arith.constant 0 : index
    %c0_0 = arith.constant 0 : index
    %0 = vector.load %arg1[%c0, %c0_0] : memref<16x256xbf16, #tpu.memory_space<vmem>>, vector<16x256xbf16>
    %c0_1 = arith.constant 0 : index
    %c0_2 = arith.constant 0 : index
    %1 = vector.load %arg2[%c0_1, %c0_2] : memref<256x128xbf16, #tpu.memory_space<vmem>>, vector<256x128xbf16>
    %cst = arith.constant dense<0.000000e+00> : vector<16x128xf32>
    %2 = tpu.matmul %0, %1, %cst {dimension_numbers = #tpu.dot_dimension_numbers<[1], [0], [0], [1], [0, 0, 1, 1], [], []>} : vector<16x256xbf16>, vector<256x128xbf16>, vector<16x128xf32> -> vector<16x128xf32>
    %c0_3 = arith.constant 0 : index
    %c0_4 = arith.constant 0 : index
    %3 = vector.load %arg3[%c0_3, %c0_4] : memref<1x128xf32, #tpu.memory_space<vmem>>, vector<1x128xf32>
    %4 = vector.broadcast %3 : vector<1x128xf32> to vector<16x128xf32>
    %5 = arith.addf %2, %4 : vector<16x128xf32>
    %cst_5 = arith.constant 0.000000e+00 : f32
    %6 = vector.broadcast %cst_5 : f32 to vector<16x128xf32>
    %7 = arith.maximumf %5, %6 : vector<16x128xf32>
    %8 = arith.truncf %7 : vector<16x128xf32> to vector<16x128xbf16>
    %c0_6 = arith.constant 0 : index
    %c0_7 = arith.constant 0 : index
    %9 = vector.load %arg4[%c0_6, %c0_7] : memref<128x128xbf16, #tpu.memory_space<vmem>>, vector<128x128xbf16>
    %cst_8 = arith.constant dense<0.000000e+00> : vector<16x128xf32>
    %10 = tpu.matmul %8, %9, %cst_8 {dimension_numbers = #tpu.dot_dimension_numbers<[1], [0], [0], [1], [0, 0, 1, 1], [], []>} : vector<16x128xbf16>, vector<128x128xbf16>, vector<16x128xf32> -> vector<16x128xf32>
    %c0_9 = arith.constant 0 : index
    %c0_10 = arith.constant 0 : index
    %11 = vector.load %arg5[%c0_9, %c0_10] : memref<1x128xf32, #tpu.memory_space<vmem>>, vector<1x128xf32>
    %12 = vector.broadcast %11 : vector<1x128xf32> to vector<16x128xf32>
    %13 = arith.addf %10, %12 : vector<16x128xf32>
    %cst_11 = arith.constant 0.000000e+00 : f32
    %14 = vector.broadcast %cst_11 : f32 to vector<16x128xf32>
    %15 = arith.maximumf %13, %14 : vector<16x128xf32>
    %16 = arith.truncf %15 : vector<16x128xf32> to vector<16x128xbf16>
    %c0_12 = arith.constant 0 : index
    %c0_13 = arith.constant 0 : index
    %17 = vector.load %arg6[%c0_12, %c0_13] : memref<128x128xbf16, #tpu.memory_space<vmem>>, vector<128x128xbf16>
    %cst_14 = arith.constant dense<0.000000e+00> : vector<16x128xf32>
    %18 = tpu.matmul %16, %17, %cst_14 {dimension_numbers = #tpu.dot_dimension_numbers<[1], [0], [0], [1], [0, 0, 1, 1], [], []>} : vector<16x128xbf16>, vector<128x128xbf16>, vector<16x128xf32> -> vector<16x128xf32>
    %c0_15 = arith.constant 0 : index
    %c0_16 = arith.constant 0 : index
    %19 = vector.load %arg7[%c0_15, %c0_16] : memref<1x128xf32, #tpu.memory_space<vmem>>, vector<1x128xf32>
    %20 = vector.broadcast %19 : vector<1x128xf32> to vector<16x128xf32>
    %21 = arith.addf %18, %20 : vector<16x128xf32>
    %c0_17 = arith.constant 0 : index
    %c0_18 = arith.constant 0 : index
    %22 = vector.load %arg8[%c0_17, %c0_18] : memref<16x128xf32, #tpu.memory_space<vmem>>, vector<16x128xf32>
    tpu.vector_store %arg8[%c0_17, %c0_18], %21 {strides = array<i32>} : memref<16x128xf32, #tpu.memory_space<vmem>>, vector<16x128xf32>,
    return
  }
  func.func @transform_0(%arg0: i32) -> (i32, i32) {
    %c0_i32 = arith.constant 0 : i32
    %c0_i32_0 = arith.constant 0 : i32
    return %arg0, %c0_i32 : i32, i32
  }
  func.func @transform_1(%arg0: i32) -> (i32, i32) {
    %c0_i32 = arith.constant 0 : i32
    %c0_i32_0 = arith.constant 0 : i32
    %c0_i32_1 = arith.constant 0 : i32
    return %c0_i32, %c0_i32_0 : i32, i32
  }
  func.func @transform_2(%arg0: i32) -> (i32, i32) {
    %c0_i32 = arith.constant 0 : i32
    %c0_i32_0 = arith.constant 0 : i32
    %c0_i32_1 = arith.constant 0 : i32
    return %c0_i32, %c0_i32_0 : i32, i32
  }
  func.func @transform_3(%arg0: i32) -> (i32, i32) {
    %c0_i32 = arith.constant 0 : i32
    %c0_i32_0 = arith.constant 0 : i32
    %c0_i32_1 = arith.constant 0 : i32
    return %c0_i32, %c0_i32_0 : i32, i32
  }
  func.func @transform_4(%arg0: i32) -> (i32, i32) {
    %c0_i32 = arith.constant 0 : i32
    %c0_i32_0 = arith.constant 0 : i32
    %c0_i32_1 = arith.constant 0 : i32
    return %c0_i32, %c0_i32_0 : i32, i32
  }
  func.func @transform_5(%arg0: i32) -> (i32, i32) {
    %c0_i32 = arith.constant 0 : i32
    %c0_i32_0 = arith.constant 0 : i32
    %c0_i32_1 = arith.constant 0 : i32
    return %c0_i32, %c0_i32_0 : i32, i32
  }
  func.func @transform_6(%arg0: i32) -> (i32, i32) {
    %c0_i32 = arith.constant 0 : i32
    %c0_i32_0 = arith.constant 0 : i32
    %c0_i32_1 = arith.constant 0 : i32
    return %c0_i32, %c0_i32_0 : i32, i32
  }
  func.func @transform_7(%arg0: i32) -> (i32, i32) {
    %c0_i32 = arith.constant 0 : i32
    %c0_i32_0 = arith.constant 0 : i32
    return %arg0, %c0_i32 : i32, i32
  }
}

</mosaic_0001>

<bundles_post_ra>
// kernel: div.17
= control target key start
LH: loop header
LB: loop body
LE: loop exit
PB: predicated region body
PF: predicated region fallthrough
CT: control target
= control target key end

     0   :  { %vm7_vm0 = vcmask 64512   ;;  %s39_s0 = inlined_call_operand.vmem [shape: f32[16], index: 0, kind: input, shape index: {}]   ;;  %s40_s1 = inlined_call_operand.vmem [shape: f32[2,8], index: 1, kind: output, shape index: {}]  }
   0x1   :  { %v4_v0 = vld [vmem:[%s39_s0] sm:$0x1]  ;;  %s22_s0 = smov 120  }
   0x2   :  { %5 = vst [vmem:[#allocation1] sm:$0x1] %v4_v0 }
   0x9   :  { %v9_v1 = vld [vmem:[#allocation1] sm:$0x1]  }
   0xa   :  { %v6_v2 = vld [vmem:[#allocation1] sm:$0x1]   ;;  %10 = vrot.lane.b32.xlu0 %v9_v1, %s22_s0 }
   0xb   :  { %8 = vst.msk [vmem:[#allocation0] sm:$0x1] %vm7_vm0, %v6_v2  }
  0x7c   :  { %v11_v3 = vpop.permute.xlu0 %10  }
  0x7d   :  { %14 = vst.msk [vmem:[#allocation0 + $0x1] sm:$0x1] %vm7_vm0, %v11_v3  }
  0x84   :  { %v17_v4 = vld [vmem:[#allocation0] sm:$0x3] }
  0x85   :  { %20 = vst [vmem:[%s40_s1] sm:$0x3] %v17_v4 }

// kernel: fastrcnn_forward.1
= control target key start
LH: loop header
LB: loop body
LE: loop exit
PB: predicated region body
PF: predicated region fallthrough
CT: control target
= control target key end

     0   :  { %s710_s1 = inlined_call_operand.vmem [shape: bf16[256,128], index: 1, kind: input, shape index: {}]   ;;  %s711_s3 = inlined_call_operand.vmem [shape: bf16[128,128], index: 3, kind: input, shape index: {}]   ;;  %s712_s2 = inlined_call_operand.vmem [shape: f32[1,128], index: 2, kind: input, shape index: {}]   ;;  %s713_s0 = inlined_call_operand.vmem [shape: bf16[16,256], index: 0, kind: input, shape index: {}]   ;;  %s714_s4 = inlined_call_operand.vmem [shape: f32[1,128], index: 4, kind: input, shape index: {}]   ;;  %s715_s5 = inlined_call_operand.vmem [shape: bf16[128,128], index: 5, kind: input, shape index: {}]   ;;  %s716_s6 = inlined_call_operand.vmem [shape: f32[1,128], index: 6, kind: input, shape index: {}]   ;;  %s717_s7 = inlined_call_operand.vmem [shape: f32[16,128], index: 7, kind: output, shape index: {}]  }
   0x1   :  { %v519_v0 = vld [vmem:[%s710_s1 + $0x38] sm:$0xff]  ;;  %v518_v2 = vld [vmem:[%s710_s1 + $0x30] sm:$0xff]  ;;  %v517_v4 = vld [vmem:[%s710_s1 + $0x28] sm:$0xff] }
   0x2   :  { %v527_v1 = vld [vmem:[%s710_s1 + $0x78] sm:$0xff]  ;;  %170 = vmatpush.bf16.msra.mxu0 %v519_v0  ;;  %v526_v3 = vld [vmem:[%s710_s1 + $0x70] sm:$0xff]  ;;  %v525_v5 = vld [vmem:[%s710_s1 + $0x68] sm:$0xff] }
   0x3   :  { %184 = vmatpush.bf16.msra.mxu1 %v527_v1  ;;  %v535_v6 = vld [vmem:[%s711_s3 + $0x38] sm:$0xff]  ;;  %v534_v7 = vld [vmem:[%s711_s3 + $0x30] sm:$0xff]  ;;  %v516_v8 = vld [vmem:[%s710_s1 + $0x20] sm:$0xff] }
   0x4   :  { %269 = vmatpush.bf16.msra.mxu2 %v535_v6  ;;  %v524_v9 = vld [vmem:[%s710_s1 + $0x60] sm:$0xff]  ;;  %v533_v10 = vld [vmem:[%s711_s3 + $0x28] sm:$0xff]  ;;  %v515_v11 = vld [vmem:[%s710_s1 + $0x18] sm:$0xff] }
   0x5   :  { %v523_v12 = vld [vmem:[%s710_s1 + $0x58] sm:$0xff]  ;;  %v532_v13 = vld [vmem:[%s711_s3 + $0x20] sm:$0xff]  ;;  %v514_v14 = vld [vmem:[%s710_s1 + $0x10] sm:$0xff] }
   0x6   :  { %171 = vmatpush.bf16.msra.mxu0 %v518_v2  ;;  %v522_v15 = vld [vmem:[%s710_s1 + $0x50] sm:$0xff]  ;;  %v513_v16 = vld [vmem:[%s710_s1 + $0x8] sm:$0xff]  ;;  %v512_v18 = vld [vmem:[%s710_s1] sm:$0xff] }
   0x7   :  { %185 = vmatpush.bf16.msra.mxu1 %v526_v3  ;;  %v521_v17 = vld [vmem:[%s710_s1 + $0x48] sm:$0xff]  ;;  %v520_v19 = vld [vmem:[%s710_s1 + $0x40] sm:$0xff]  ;;  %v531_v26 = vld [vmem:[%s711_s3 + $0x18] sm:$0xff] }
   0x8   :  { %270 = vmatpush.bf16.msra.mxu2 %v534_v7  ;;  %v376_v20 = vld [vmem:[%s713_s0] sm:$0xf]  ;;  %v511_v21 = vld [vmem:[%s713_s0 + $0x4] sm:$0xf0]  ;;  %v510_v22 = vld [vmem:[%s713_s0 + $0x4] sm:$0xf] }
   0x9   :  { %v378_v23 = vld [vmem:[%s713_s0 + $0x8] sm:$0xf0]  ;;  %v377_v24 = vor.u32 %v511_v21, %v376_v20  ;;  %v530_v27 = vld [vmem:[%s711_s3 + $0x10] sm:$0xff]  ;;  %v528_v29 = vld [vmem:[%s711_s3] sm:$0xff] }
   0xa   :  { %172 = vmatpush.bf16.msra.mxu0 %v517_v4  ;;  %v381_v25 = vor.u32 %v510_v22, %v378_v23  ;;  %v529_v28 = vld [vmem:[%s711_s3 + $0x8] sm:$0xff]  ;;  %v543_v30 = vld [vmem:[%s715_s5 + $0x38] sm:$0xff]  ;;  %v542_v31 = vld [vmem:[%s715_s5 + $0x30] sm:$0xff] }
   0xb   :  { %186 = vmatpush.bf16.msra.mxu1 %v525_v5  ;;  %354 = vmatpush.bf16.msra.mxu3 %v543_v30  ;;  %v541_v32 = vld [vmem:[%s715_s5 + $0x28] sm:$0xff]  ;;  %v540_v33 = vld [vmem:[%s715_s5 + $0x20] sm:$0xff]  ;;  %v539_v46 = vld [vmem:[%s715_s5 + $0x18] sm:$0xff] }
   0xc   :  { %271 = vmatpush.bf16.msra.mxu2 %v533_v10  ;;  %v544_v36 = vld [vmem:[%s712_s2] ss:$0 sm:$0xff]  ;;  %v538_v47 = vld [vmem:[%s715_s5 + $0x10] sm:$0xff]  ;;  %v537_v48 = vld [vmem:[%s715_s5 + $0x8] sm:$0xff] }
   0xd   :  { %v536_v49 = vld [vmem:[%s715_s5] sm:$0xff] }
   0xe   :  { %173 = vmatpush.bf16.msra.mxu0 %v516_v8  ;;  %v545_v51 = vld [vmem:[%s714_s4] ss:$0 sm:$0xff] }
   0xf   :  { %187 = vmatpush.bf16.msra.mxu1 %v524_v9  ;;  %355 = vmatpush.bf16.msra.mxu3 %v542_v31  ;;  %v546_v58 = vld [vmem:[%s716_s6] ss:$0 sm:$0xff] }
  0x10   :  { %272 = vmatpush.bf16.msra.mxu2 %v532_v13 }
  0x12   :  { %174 = vmatpush.bf16.msra.mxu0 %v515_v11 }
  0x13   :  { %188 = vmatpush.bf16.msra.mxu1 %v523_v12  ;;  %356 = vmatpush.bf16.msra.mxu3 %v541_v32 }
  0x14   :  { %273 = vmatpush.bf16.msra.mxu2 %v531_v26 }
  0x16   :  { %175 = vmatpush.bf16.msra.mxu0 %v514_v14 }
  0x17   :  { %189 = vmatpush.bf16.msra.mxu1 %v522_v15  ;;  %357 = vmatpush.bf16.msra.mxu3 %v540_v33 }
  0x18   :  { %274 = vmatpush.bf16.msra.mxu2 %v530_v27 }
  0x1a   :  { %176 = vmatpush.bf16.msra.mxu0 %v513_v16 }
  0x1b   :  { %190 = vmatpush.bf16.msra.mxu1 %v521_v17  ;;  %358 = vmatpush.bf16.msra.mxu3 %v539_v46 }
  0x1c   :  { %275 = vmatpush.bf16.msra.mxu2 %v529_v28 }
  0x1e   :  { %177 = vmatpush.bf16.msra.mxu0 %v512_v18 }
  0x1f   :  { %191 = vmatpush.bf16.msra.mxu1 %v520_v19  ;;  %359 = vmatpush.bf16.msra.mxu3 %v538_v47 }
  0x20   :  { %276 = vmatpush.bf16.msra.mxu2 %v528_v29 }
  0x21   :  { %178 = vmatmul.bf16.vlgmr.msra.gmra.mxu0 %v377_v24 }
  0x22   :  { %192 = vmatmul.bf16.vlgmr.msra.gmra.mxu1 %v381_v25 }
  0x23   :  { %360 = vmatpush.bf16.msra.mxu3 %v537_v48 }
  0x27   :  { %361 = vmatpush.bf16.msra.mxu3 %v536_v49 }
  0x9e   :  { %v179_v34 = vpop.f32.mrf.mxu0 }
  0x9f   :  { %v193_v35 = vpop.f32.mrf.mxu1  ;;  %v180_v37 = vadd.f32 %v544_v36, %v179_v34 }
  0xa1   :  { %v194_v39 = vadd.f32 %v193_v35, %v180_v37 }
  0xa3   :  { %v198_v43 = vmax.f32 %v194_v39, 0.0 }
  0xa6   :  { %v181_v38 = vpop.f32.mrf.mxu0 }
  0xa7   :  { %v182_v40 = vadd.f32 %v544_v36, %v181_v38  ;;  %v195_v41 = vpop.f32.mrf.mxu1 }
  0xa9   :  { %v196_v42 = vadd.f32 %v195_v41, %v182_v40 }
  0xab   :  { %v199_v44 = vmax.f32 %v196_v42, 0.0 }
  0xad   :  { %v200_v45 = vpack.c.bf16 %v199_v44, %v198_v43 }
  0xaf   :  { %277 = vmatmul.bf16.vlgmr.msra.gmra.mxu2 %v200_v45 }
 0x132   :  { %v278_v50 = vpop.f32.mrf.mxu2 }
 0x133   :  { %v279_v52 = vadd.f32 %v545_v51, %v278_v50 }
 0x135   :  { %v283_v55 = vmax.f32 %v279_v52, 0.0 }
 0x13a   :  { %v280_v53 = vpop.f32.mrf.mxu2 }
 0x13b   :  { %v281_v54 = vadd.f32 %v545_v51, %v280_v53 }
 0x13d   :  { %v284_v56 = vmax.f32 %v281_v54, 0.0 }
 0x13f   :  { %v285_v57 = vpack.c.bf16 %v284_v56, %v283_v55 }
 0x141   :  { %362 = vmatmul.bf16.vlgmr.msra.gmra.mxu3 %v285_v57 }
 0x1c4   :  { %v363_v59 = vpop.f32.mrf.mxu3 }
 0x1c5   :  { %v364_v60 = vadd.f32 %v546_v58, %v363_v59 }
 0x1c7   :  { %368 = vst [vmem:[%s717_s7] sm:$0xff] %v364_v60 }
 0x1cc   :  { %v365_v61 = vpop.f32.mrf.mxu3 }
 0x1cd   :  { %v366_v62 = vadd.f32 %v546_v58, %v365_v61 }
 0x1cf   :  { %369 = vst [vmem:[%s717_s7 + $0x8] sm:$0xff] %v366_v62 }

</bundles_post_ra>
